<compile_context>
chip_gen: v6e
topology: v6e:2x2x1
jax: 0.10.0
libtpu: 0.0.40
codegen_flags: <defaults>
</compile_context>

<pallas_src>
import functools

import jax
import jax.numpy as jnp
import numpy as np
from jax import lax
from jax.experimental import pallas as pl
from jax.experimental.pallas import tpu as pltpu

_LANES = 128


def _wce_kernel(logs_ref, tgt_ref, out_ref, *, weight_bg, nch, rows_blk,
                rows_chunk, s_valid, need_mask, labels_mode):
    rc = rows_chunk
    n_chunks = rows_blk // rows_chunk
    s_idx = pl.program_id(1)

    def chunk_loss(r0, apply_mask, base_idx):
        # ---- pass 1: channel max + true-class logit + bg weight (pure VPU) --
        x0 = logs_ref[0, 0, pl.ds(r0, rc), :].astype(jnp.float32)
        m = x0
        if labels_mode:
            lab = tgt_ref[0, pl.ds(r0, rc), :]
            x_true = jnp.where(lab == 0, x0, 0.0)
            w = jnp.where(lab == 0, weight_bg, 1.0)
            for c in range(1, nch):
                xc = logs_ref[0, c, pl.ds(r0, rc), :].astype(jnp.float32)
                m = jnp.maximum(m, xc)
                x_true = jnp.where(lab == c, xc, x_true)
        else:
            # running argmax over the (possibly soft) one-hot target channels;
            # strict '>' keeps the FIRST maximum, matching torch.argmax.
            y0 = tgt_ref[0, 0, pl.ds(r0, rc), :].astype(jnp.float32)
            ymax, x_true = y0, x0
            is_bg = jnp.ones_like(x0)
            for c in range(1, nch):
                xc = logs_ref[0, c, pl.ds(r0, rc), :].astype(jnp.float32)
                yc = tgt_ref[0, c, pl.ds(r0, rc), :].astype(jnp.float32)
                m = jnp.maximum(m, xc)
                upd = yc > ymax
                ymax = jnp.where(upd, yc, ymax)
                x_true = jnp.where(upd, xc, x_true)
                is_bg = jnp.where(upd, 0.0, is_bg)
            w = 1.0 + (weight_bg - 1.0) * is_bg

        # ---- pass 2: stable logsumexp over channels (exp/log -> EUP) --------
        esum = jnp.zeros((rc, _LANES), jnp.float32)
        for c in range(nch):
            xc = logs_ref[0, c, pl.ds(r0, rc), :].astype(jnp.float32)
            esum = esum + jnp.exp(xc - m)
        lse = m + jnp.log(esum)

        per_pix = w * (lse - x_true)
        if apply_mask:
            gidx = (s_idx * rows_blk + r0) * _LANES + base_idx
            per_pix = jnp.where(gidx < s_valid, per_pix, 0.0)
        return per_pix

    def block_lane_sums(apply_mask):
        if apply_mask:
            # hoisted out of the chunk loop (only the offset varies per chunk)
            ri = lax.broadcasted_iota(jnp.int32, (rc, _LANES), 0)
            li = lax.broadcasted_iota(jnp.int32, (rc, _LANES), 1)
            base_idx = ri * _LANES + li
        else:
            base_idx = None
        if n_chunks == 1:
            acc = chunk_loss(0, apply_mask, base_idx)
        else:
            def body(ci, acc):
                r0 = pl.multiple_of(ci * rc, 8)
                return acc + chunk_loss(r0, apply_mask, base_idx)

            acc = lax.fori_loop(0, n_chunks, body,
                                jnp.zeros((rc, _LANES), jnp.float32),
                                unroll=2)
        # lane-dense (1, 1, 1, 128) per-lane partial sums for this block
        return jnp.sum(acc, axis=0, keepdims=True)[None, None]

    if need_mask:
        is_last = s_idx == pl.num_programs(1) - 1

        @pl.when(is_last)
        def _():
            out_ref[...] = block_lane_sums(True)

        @pl.when(jnp.logical_not(is_last))
        def _():
            out_ref[...] = block_lane_sums(False)
    else:
        out_ref[...] = block_lane_sums(False)


def cross_entropy_weighted_bg_loss(logs, yb_oh=None, *, weight_bg,
                                   n_fg_classes=None, mask=None, labels=None,
                                   max_block_rows=None):
    """Pallas TPU implementation of cross_entropy_weighted_bg.forward.

    Either `yb_oh` (one-hot target, same shape as logs — matches the PyTorch
    module) or `labels` (integer class map, shape logs.shape[:1]+spatial —
    byte-diet fast path) must be provided.
    """
    # TODO(synk): the optional `mask` argument of the PyTorch module is not
    # supported here (default mask=None path only).
    assert mask is None
    nb, nch = logs.shape[:2]
    if n_fg_classes is not None:
        assert nch == n_fg_classes + 1
    spatial = logs.shape[2:]
    S = int(np.prod(spatial))

    labels_mode = labels is not None
    if labels_mode:
        assert labels.shape == (nb,) + tuple(spatial)
    else:
        assert yb_oh is not None and yb_oh.shape == logs.shape

    # ---- lane-dense spatial layout: (rows, 128) -----------------------------
    # Pad the spatial axis only up to the next 128 multiple (free reshape, no
    # HBM copy, when S is already 128-aligned).  Block-granularity padding is
    # never materialized: partial trailing rows-blocks are handled by the grid
    # plus in-kernel masking.
    # TODO(synk): a fully copy-free path for S % 128 != 0 (3-D blocks over
    # (nb, nch, S)) is possible but trades away the lane-dense 2-D layout.
    pad = (-S) % _LANES
    rows_total = (S + pad) // _LANES

    logs_r = logs.reshape(nb, nch, S)
    if pad:
        logs_r = jnp.pad(logs_r, ((0, 0), (0, 0), (0, pad)))
    logs_r = logs_r.reshape(nb, nch, rows_total, _LANES)

    if labels_mode:
        tgt = labels.reshape(nb, S).astype(jnp.int32)
        if pad:
            tgt = jnp.pad(tgt, ((0, 0), (0, pad)))
        tgt = tgt.reshape(nb, rows_total, _LANES)
    else:
        tgt = yb_oh.reshape(nb, nch, S)
        if pad:
            tgt = jnp.pad(tgt, ((0, 0), (0, 0), (0, pad)))
        tgt = tgt.reshape(nb, nch, rows_total, _LANES)

    # ---- block sizing: ~2 MiB logits blocks, clamped to the VMEM budget -----
    row_bytes_logs = nch * _LANES * logs_r.dtype.itemsize
    row_bytes_tgt = (_LANES * 4) if labels_mode else nch * _LANES * tgt.dtype.itemsize
    rows_target = (2 << 20) // row_bytes_logs
    # keep 2 inputs x double-buffering comfortably inside scoped VMEM (#9)
    rows_cap = (28 << 20) // (2 * (row_bytes_logs + row_bytes_tgt))
    rows_target = max(16, min(rows_target, rows_cap) // 16 * 16)
    # TODO(synk): for very large nch the 16-row floor can still exceed the
    # budget; a channel-tiled (online-logsumexp) variant would be needed.
    if max_block_rows is not None:
        rows_target = max(8, min(rows_target, max_block_rows) // 8 * 8)

    if rows_total % 8 != 0 and rows_total > 64:
        rows_blk = min(rows_target, rows_total // 8 * 8)
    elif rows_total <= rows_target:
        rows_blk = rows_total                    # single block == full dim
    else:
        rows_blk = rows_target                   # multiple of 8; tail allowed
    n_sblocks = pl.cdiv(rows_total, rows_blk)
    need_mask = (n_sblocks * rows_blk * _LANES != S)

    if rows_blk % 16 == 0:
        rows_chunk = 16
    elif rows_blk % 8 == 0:
        rows_chunk = 8
    else:
        rows_chunk = rows_blk                    # small single-chunk block

    if labels_mode:
        tgt_spec = pl.BlockSpec((1, rows_blk, _LANES), lambda b, s: (b, s, 0))
    else:
        tgt_spec = pl.BlockSpec((1, nch, rows_blk, _LANES),
                                lambda b, s: (b, 0, s, 0))

    kernel = functools.partial(
        _wce_kernel, weight_bg=float(weight_bg), nch=nch, rows_blk=rows_blk,
        rows_chunk=rows_chunk, s_valid=S, need_mask=need_mask,
        labels_mode=labels_mode)

    partial_sums = pl.pallas_call(
        kernel,
        out_shape=jax.ShapeDtypeStruct((nb, n_sblocks, 1, _LANES), jnp.float32),
        grid_spec=pltpu.PrefetchScalarGridSpec(
            num_scalar_prefetch=0,
            grid=(nb, n_sblocks),
            in_specs=[
                pl.BlockSpec((1, nch, rows_blk, _LANES),
                             lambda b, s: (b, 0, s, 0)),
                tgt_spec,
            ],
            out_specs=pl.BlockSpec((1, 1, 1, _LANES), lambda b, s: (b, s, 0, 0)),
        ),
        compiler_params=pltpu.CompilerParams(
            dimension_semantics=("parallel", "parallel"),
            vmem_limit_bytes=48 * 1024 * 1024),
    )(logs_r, tgt)

    # tiny finalize in plain JAX: mean over all nb * S (real) pixels
    return jnp.sum(partial_sums) / (nb * S)


def _reference_loss(logs, yb_oh, weight_bg):
    y = jnp.argmax(yb_oh, axis=1)
    logp = jax.nn.log_softmax(logs, axis=1)
    nll = -jnp.take_along_axis(logp, y[:, None], axis=1)[:, 0]
    w = jnp.where(y == 0, float(weight_bg), 1.0)
    return jnp.mean(w * nll)


if __name__ == "__main__":
    key = jax.random.PRNGKey(0)
    weight_bg = 0.3
    n_fg = 3
    nch = n_fg + 1

    # (nb, H, W, max_block_rows)
    cases = [
        (2, 16, 16, None),   # S % 128 == 0: no padding, single block, no mask
        (2, 23, 23, None),   # S % 128 != 0: 128-pad + in-kernel tail masking
        (2, 96, 96, 64),     # multi spatial blocks + partial trailing block
    ]

    ok = True
    for idx, (nb, H, W, mbr) in enumerate(cases):
        key, k_logs, k_lbl = jax.random.split(key, 3)
        logs = jax.random.normal(k_logs, (nb, nch, H, W), dtype=jnp.float32)
        labels = jax.random.randint(k_lbl, (nb, H, W), 0, nch)
        yb_oh = jax.nn.one_hot(labels, nch, axis=1, dtype=jnp.float32)

        ref = _reference_loss(logs, yb_oh, weight_bg)
        loss_oh = cross_entropy_weighted_bg_loss(
            logs, yb_oh, weight_bg=weight_bg, n_fg_classes=n_fg,
            max_block_rows=mbr)
        loss_lb = cross_entropy_weighted_bg_loss(
            logs, weight_bg=weight_bg, n_fg_classes=n_fg, labels=labels,
            max_block_rows=mbr)
        loss_oh, loss_lb, ref = jax.block_until_ready((loss_oh, loss_lb, ref))

        for name, val in (("one_hot", loss_oh), ("labels", loss_lb)):
            if not np.allclose(np.asarray(val), np.asarray(ref),
                               rtol=1e-4, atol=1e-5):
                ok = False
                print(f"MISMATCH case={idx} path={name}: "
                      f"{float(val)} vs {float(ref)}")

    assert ok, "Pallas kernel does not match the reference loss"
    print("KERNEL_OK")
</pallas_src>

<mosaic_0001>
module attributes {stable_mosaic.version = 11 : i64} {
  func.func @_wce_kernel(%arg0: i32, %arg1: i32, %arg2: memref<1x4x2x128xf32, #tpu.memory_space<vmem>>, %arg3: memref<1x4x2x128xf32, #tpu.memory_space<vmem>>, %arg4: memref<1x1x1x128xf32, #tpu.memory_space<vmem>>) attributes {dimension_semantics = [#tpu.dimension_semantics<parallel>, #tpu.dimension_semantics<parallel>], iteration_bounds = array<i64: 2, 1>, scalar_prefetch = 0 : i64, scratch_operands = 0 : i64, tpu.core_type = #tpu.core_type<tc>, window_params = [{transform_indices = @transform_0, window_bounds = array<i64: 1, 4, 2, 128>}, {transform_indices = @transform_1, window_bounds = array<i64: 1, 4, 2, 128>}, {transform_indices = @transform_2, window_bounds = array<i64: 1, 1, 1, 128>}]} {
    %c0 = arith.constant 0 : index
    %c0_0 = arith.constant 0 : index
    %c0_1 = arith.constant 0 : index
    %c0_2 = arith.constant 0 : index
    %0 = vector.load %arg2[%c0, %c0_0, %c0_1, %c0_2] : memref<1x4x2x128xf32, #tpu.memory_space<vmem>>, vector<1x1x2x128xf32>
    %1 = vector.shape_cast %0 : vector<1x1x2x128xf32> to vector<2x128xf32>
    %c0_3 = arith.constant 0 : index
    %c0_4 = arith.constant 0 : index
    %c0_5 = arith.constant 0 : index
    %c0_6 = arith.constant 0 : index
    %2 = vector.load %arg3[%c0_3, %c0_4, %c0_5, %c0_6] : memref<1x4x2x128xf32, #tpu.memory_space<vmem>>, vector<1x1x2x128xf32>
    %3 = vector.shape_cast %2 : vector<1x1x2x128xf32> to vector<2x128xf32>
    %cst = arith.constant 1.000000e+00 : f32
    %4 = vector.broadcast %cst : f32 to vector<2x128xf32>
    %c0_7 = arith.constant 0 : index
    %c1 = arith.constant 1 : index
    %c0_8 = arith.constant 0 : index
    %c0_9 = arith.constant 0 : index
    %5 = vector.load %arg2[%c0_7, %c1, %c0_8, %c0_9] : memref<1x4x2x128xf32, #tpu.memory_space<vmem>>, vector<1x1x2x128xf32>
    %6 = vector.shape_cast %5 : vector<1x1x2x128xf32> to vector<2x128xf32>
    %c0_10 = arith.constant 0 : index
    %c1_11 = arith.constant 1 : index
    %c0_12 = arith.constant 0 : index
    %c0_13 = arith.constant 0 : index
    %7 = vector.load %arg3[%c0_10, %c1_11, %c0_12, %c0_13] : memref<1x4x2x128xf32, #tpu.memory_space<vmem>>, vector<1x1x2x128xf32>
    %8 = vector.shape_cast %7 : vector<1x1x2x128xf32> to vector<2x128xf32>
    %9 = arith.maximumf %1, %6 : vector<2x128xf32>
    %10 = arith.cmpf ogt, %8, %3 : vector<2x128xf32>
    %11 = arith.select %10, %8, %3 : vector<2x128xi1>, vector<2x128xf32>
    %12 = arith.select %10, %6, %1 : vector<2x128xi1>, vector<2x128xf32>
    %cst_14 = arith.constant 0.000000e+00 : f32
    %13 = vector.broadcast %cst_14 : f32 to vector<2x128xf32>
    %14 = arith.select %10, %13, %4 : vector<2x128xi1>, vector<2x128xf32>
    %c0_15 = arith.constant 0 : index
    %c2 = arith.constant 2 : index
    %c0_16 = arith.constant 0 : index
    %c0_17 = arith.constant 0 : index
    %15 = vector.load %arg2[%c0_15, %c2, %c0_16, %c0_17] : memref<1x4x2x128xf32, #tpu.memory_space<vmem>>, vector<1x1x2x128xf32>
    %16 = vector.shape_cast %15 : vector<1x1x2x128xf32> to vector<2x128xf32>
    %c0_18 = arith.constant 0 : index
    %c2_19 = arith.constant 2 : index
    %c0_20 = arith.constant 0 : index
    %c0_21 = arith.constant 0 : index
    %17 = vector.load %arg3[%c0_18, %c2_19, %c0_20, %c0_21] : memref<1x4x2x128xf32, #tpu.memory_space<vmem>>, vector<1x1x2x128xf32>
    %18 = vector.shape_cast %17 : vector<1x1x2x128xf32> to vector<2x128xf32>
    %19 = arith.maximumf %9, %16 : vector<2x128xf32>
    %20 = arith.cmpf ogt, %18, %11 : vector<2x128xf32>
    %21 = arith.select %20, %18, %11 : vector<2x128xi1>, vector<2x128xf32>
    %22 = arith.select %20, %16, %12 : vector<2x128xi1>, vector<2x128xf32>
    %cst_22 = arith.constant 0.000000e+00 : f32
    %23 = vector.broadcast %cst_22 : f32 to vector<2x128xf32>
    %24 = arith.select %20, %23, %14 : vector<2x128xi1>, vector<2x128xf32>
    %c0_23 = arith.constant 0 : index
    %c3 = arith.constant 3 : index
    %c0_24 = arith.constant 0 : index
    %c0_25 = arith.constant 0 : index
    %25 = vector.load %arg2[%c0_23, %c3, %c0_24, %c0_25] : memref<1x4x2x128xf32, #tpu.memory_space<vmem>>, vector<1x1x2x128xf32>
    %26 = vector.shape_cast %25 : vector<1x1x2x128xf32> to vector<2x128xf32>
    %c0_26 = arith.constant 0 : index
    %c3_27 = arith.constant 3 : index
    %c0_28 = arith.constant 0 : index
    %c0_29 = arith.constant 0 : index
    %27 = vector.load %arg3[%c0_26, %c3_27, %c0_28, %c0_29] : memref<1x4x2x128xf32, #tpu.memory_space<vmem>>, vector<1x1x2x128xf32>
    %28 = vector.shape_cast %27 : vector<1x1x2x128xf32> to vector<2x128xf32>
    %29 = arith.maximumf %19, %26 : vector<2x128xf32>
    %30 = arith.cmpf ogt, %28, %21 : vector<2x128xf32>
    %31 = arith.select %30, %26, %22 : vector<2x128xi1>, vector<2x128xf32>
    %cst_30 = arith.constant 0.000000e+00 : f32
    %32 = vector.broadcast %cst_30 : f32 to vector<2x128xf32>
    %33 = arith.select %30, %32, %24 : vector<2x128xi1>, vector<2x128xf32>
    %cst_31 = arith.constant -0.699999988 : f32
    %34 = vector.broadcast %cst_31 : f32 to vector<2x128xf32>
    %35 = arith.mulf %34, %33 : vector<2x128xf32>
    %cst_32 = arith.constant 1.000000e+00 : f32
    %36 = vector.broadcast %cst_32 : f32 to vector<2x128xf32>
    %37 = arith.addf %36, %35 : vector<2x128xf32>
    %cst_33 = arith.constant 0.000000e+00 : f32
    %38 = vector.broadcast %cst_33 : f32 to vector<2x128xf32>
    %c0_34 = arith.constant 0 : index
    %c0_35 = arith.constant 0 : index
    %c0_36 = arith.constant 0 : index
    %c0_37 = arith.constant 0 : index
    %39 = vector.load %arg2[%c0_34, %c0_35, %c0_36, %c0_37] : memref<1x4x2x128xf32, #tpu.memory_space<vmem>>, vector<1x1x2x128xf32>
    %40 = vector.shape_cast %39 : vector<1x1x2x128xf32> to vector<2x128xf32>
    %41 = arith.subf %40, %29 : vector<2x128xf32>
    %42 = math.exp %41 : vector<2x128xf32>
    %43 = arith.addf %38, %42 : vector<2x128xf32>
    %c0_38 = arith.constant 0 : index
    %c1_39 = arith.constant 1 : index
    %c0_40 = arith.constant 0 : index
    %c0_41 = arith.constant 0 : index
    %44 = vector.load %arg2[%c0_38, %c1_39, %c0_40, %c0_41] : memref<1x4x2x128xf32, #tpu.memory_space<vmem>>, vector<1x1x2x128xf32>
    %45 = vector.shape_cast %44 : vector<1x1x2x128xf32> to vector<2x128xf32>
    %46 = arith.subf %45, %29 : vector<2x128xf32>
    %47 = math.exp %46 : vector<2x128xf32>
    %48 = arith.addf %43, %47 : vector<2x128xf32>
    %c0_42 = arith.constant 0 : index
    %c2_43 = arith.constant 2 : index
    %c0_44 = arith.constant 0 : index
    %c0_45 = arith.constant 0 : index
    %49 = vector.load %arg2[%c0_42, %c2_43, %c0_44, %c0_45] : memref<1x4x2x128xf32, #tpu.memory_space<vmem>>, vector<1x1x2x128xf32>
    %50 = vector.shape_cast %49 : vector<1x1x2x128xf32> to vector<2x128xf32>
    %51 = arith.subf %50, %29 : vector<2x128xf32>
    %52 = math.exp %51 : vector<2x128xf32>
    %53 = arith.addf %48, %52 : vector<2x128xf32>
    %c0_46 = arith.constant 0 : index
    %c3_47 = arith.constant 3 : index
    %c0_48 = arith.constant 0 : index
    %c0_49 = arith.constant 0 : index
    %54 = vector.load %arg2[%c0_46, %c3_47, %c0_48, %c0_49] : memref<1x4x2x128xf32, #tpu.memory_space<vmem>>, vector<1x1x2x128xf32>
    %55 = vector.shape_cast %54 : vector<1x1x2x128xf32> to vector<2x128xf32>
    %56 = arith.subf %55, %29 : vector<2x128xf32>
    %57 = math.exp %56 : vector<2x128xf32>
    %58 = arith.addf %53, %57 : vector<2x128xf32>
    %59 = math.log %58 : vector<2x128xf32>
    %60 = arith.addf %29, %59 : vector<2x128xf32>
    %61 = arith.subf %60, %31 : vector<2x128xf32>
    %62 = arith.mulf %37, %61 : vector<2x128xf32>
    %cst_50 = arith.constant dense<0.000000e+00> : vector<128xf32>
    %63 = vector.multi_reduction <add>, %62, %cst_50 [0] : vector<2x128xf32> to vector<128xf32>
    %64 = vector.shape_cast %63 : vector<128xf32> to vector<1x128xf32>
    %65 = vector.shape_cast %64 : vector<1x128xf32> to vector<1x1x1x128xf32>
    %c0_51 = arith.constant 0 : index
    %c0_52 = arith.constant 0 : index
    %c0_53 = arith.constant 0 : index
    %c0_54 = arith.constant 0 : index
    %66 = vector.load %arg4[%c0_51, %c0_52, %c0_53, %c0_54] : memref<1x1x1x128xf32, #tpu.memory_space<vmem>>, vector<1x1x1x128xf32>
    tpu.vector_store %arg4[%c0_51, %c0_52, %c0_53, %c0_54], %65 {strides = array<i32>} : memref<1x1x1x128xf32, #tpu.memory_space<vmem>>, vector<1x1x1x128xf32>,
    return
  }
  func.func @transform_0(%arg0: i32, %arg1: i32) -> (i32, i32, i32, i32) {
    %c0_i32 = arith.constant 0 : i32
    %c0_i32_0 = arith.constant 0 : i32
    %c0_i32_1 = arith.constant 0 : i32
    return %arg0, %c0_i32, %arg1, %c0_i32_0 : i32, i32, i32, i32
  }
  func.func @transform_1(%arg0: i32, %arg1: i32) -> (i32, i32, i32, i32) {
    %c0_i32 = arith.constant 0 : i32
    %c0_i32_0 = arith.constant 0 : i32
    %c0_i32_1 = arith.constant 0 : i32
    return %arg0, %c0_i32, %arg1, %c0_i32_0 : i32, i32, i32, i32
  }
  func.func @transform_2(%arg0: i32, %arg1: i32) -> (i32, i32, i32, i32) {
    %c0_i32 = arith.constant 0 : i32
    %c0_i32_0 = arith.constant 0 : i32
    %c0_i32_1 = arith.constant 0 : i32
    return %arg0, %arg1, %c0_i32, %c0_i32_0 : i32, i32, i32, i32
  }
}

</mosaic_0001>

<bundles_post_ra>
// kernel: tpu_custom_call.1
= control target key start
LH: loop header
LB: loop body
LE: loop exit
PB: predicated region body
PF: predicated region fallthrough
CT: control target
= control target key end

     0   :  { %7 = vsyncpa [#allocation3], 0  ;;  %s838_s0 = inlined_call_operand.hbm [shape: f32[2,4,2,128], index: 0, kind: input, shape index: {}]   ;;  %s839_s1 = inlined_call_operand.hbm [shape: f32[2,4,2,128], index: 1, kind: input, shape index: {}]   ;;  %s840_s2 = inlined_call_operand.hbm [shape: f32[2,1,1,128], index: 2, kind: output, shape index: {}]  }
   0x1   :  { %9 = vsyncpa [#allocation3 + $0x1], 0 }
   0x2   :  { %10 = vsyncpa [#allocation6], 0 }
   0x3   :  { %12 = vsyncpa [#allocation6 + $0x1], 0 }
   0x4   :  { %13 = vsyncpa [#allocation4], 0 }
   0x5   :  { %15 = vsyncpa [#allocation4 + $0x1], 0  ;;  %s664_s9 = smov 0   ;;  %s666_s10 = smov 0  }
   0x6   :  { %s668_s11 = smov 0   ;;  %s670_s12 = smov 0  }
   0x7   :  { %s672_s13 = smov 0   ;;  %s674_s14 = smov 0  }
   0x8 LB: > { %s397_s15 = sadd.s32 4294967295, %s641_s14   ;;  %s398_s16 = sadd.s32 4294967294, %s641_s14   ;;  %s641_s14 = sphi %s674_s14, %s21_s14   ;;  %s637_s13 = sphi %s672_s13, %s852_s13   ;;  %s633_s12 = sphi %s670_s12, %s851_s12   ;;  %s629_s11 = sphi %s668_s11, %s850_s11   ;;  %s625_s10 = sphi %s666_s10, %s849_s10   ;;  %s621_s9 = sphi %s664_s9, %s848_s9  }
   0x9   : > { %s33_s17 = sadd.s32 1, %s637_s13  ;;  %s42_s18 = sadd.s32 1, %s629_s11 }
   0xa   : > { %p35_p0 = scmp.ge.s32.totalorder %s33_s17, 2  ;;  %p49_p1 = scmp.ne.s32.totalorder %s629_s11, %s625_s10 }
   0xb   : > { %p50_p2 = scmp.eq.s32.totalorder %s641_s14, 0  ;;  %p55_p3 = scmp.ne.s32.totalorder %s625_s10, %s621_s9 }
   0xc   : > { %s854_s17 = smov (%p35_p0, %s33_s17), 0  ;;  %p56_p5 = scmp.eq.s32.totalorder %s397_s15, 0 }
   0xd   : > { %p705_p4 = por %p50_p2, %p49_p1  ;;  %s37_s20 = ssub.s32 %s637_s13, %s854_s17 }
   0xe   : > { %p109_p6 = scmp.eq.s32.totalorder %s397_s15, 1  ;;  %p40_p7 = scmp.eq.s32.totalorder %s37_s20, 0 }
   0xf   : > { %p711_p8 = por %p56_p5, %p55_p3  ;;  %p115_p10 = scmp.eq.s32.totalorder %s398_s16, 1 }
  0x10   : > { %p715_p9 = por %p109_p6, %p49_p1  ;;  %p438_p13 = scmp.lt.s32.totalorder %s641_s14, 2 }
  0x11   : > { %s720_s23 = scalar_select %p40_p7, %s629_s11, %s42_s18  }
  0x12   : > { %p722_p11 = por %p115_p10, %p55_p3  ;;  %s729_s25 = sand.u32 1, %s629_s11  }
  0x13   : > { %s401_s26 = sshll.u32 %s729_s25, 3  ;;  %s419_s27 = sshll.u32 %s637_s13, 7 }
  0x14   : > { %s146_s30 = scalar_lea.hbm %s838_s0, %s419_s27  ;;  %s139_s3 = scalar_lea.vmem [#allocation2], %s401_s26 }
  0x15   : > { %s147_s4 = sshll.u32 %s139_s3, 4  ;;  %p742_p0 = pnand %p438_p13, %p705_p4  ;;  %s148_s4 = int_to_ptr.vmem [resolvable:$true] %s147_s4 }
  0x16   : > { %p407_p1 = scmp.ge.s32.totalorder %s641_s14, 1  ;;  %s136_s6 = scalar_lea.sflag [#allocation3], %s729_s25 }
  0x17   : > { %p503_p2 = pneg %p742_p0  ;;  %s514_s7 = scalar_lea.vmem %s148_s4, 128 }
  0x18   : > { %p515_p3 = scmp.ne.s32.totalorder %s148_s4, %s514_s7  ;;  %s643_s8 = smov [#allocation2]  }
  0x19   : > { %s519_s15 = sshll.u32 %s643_s8, 4  ;;  %s520_s15 = int_to_ptr.vmem [resolvable:$false] %s519_s15 }
  0x1a   : > { %p517_p5 = pnand %p515_p3, %p503_p2  ;;  %s521_s16 = scalar_lea.vmem %s520_s15, 256 }
  0x1b   : > { %p522_p4 = scmp.lt.s32.totalorder %s148_s4, %s520_s15  ;;  %p523_p7 = scmp.lt.s32.totalorder %s521_s16, %s514_s7 }
  0x1c   : > { %p518_p6 = pneg %p517_p5 }
  0x1d   : > { %p524_p10 = por %p523_p7, %p522_p4 }
  0x1f   : > { %p525_p13 = pnand %p524_p10, %p518_p6 }
  0x21   : > { %528 = shalt.err (!%p525_p13)
}
  0x22   : > { %s644_s18 = smov 32   ;;  %s645_s19 = smov 2  }
  0x23   : > { %430 = dma.hbm_to_vmem [thread:$0]  (!%p742_p0), %s146_s30, 128, %s148_s4, %s136_s6, %s644_s18, %s644_s18, %s645_s19  }
  0x24   : > { %p177_p3 = scmp.lt.s32.totalorder %s641_s14, 3  ;;  %s168_s29 = scalar_lea.hbm %s839_s1, %s419_s27 }
  0x25   : > { %s161_s7 = scalar_lea.vmem [#allocation5], %s401_s26  ;;  %s158_s15 = scalar_lea.sflag [#allocation6], %s729_s25 }
  0x26   : > { %p763_p5 = pnand %p407_p1, %p177_p3  ;;  %s169_s8 = sshll.u32 %s161_s7, 4  ;;  %s170_s8 = int_to_ptr.vmem [resolvable:$true] %s169_s8 }
  0x27   : > { %s542_s16 = scalar_lea.vmem %s170_s8, 128  ;;  %s646_s30 = smov [#allocation5]  }
  0x28   : > { %p543_p6 = scmp.ne.s32.totalorder %s170_s8, %s542_s16  ;;  %s547_s4 = sshll.u32 %s646_s30, 4  ;;  %s548_s4 = int_to_ptr.vmem [resolvable:$false] %s547_s4 }
  0x29   : > { %s549_s27 = scalar_lea.vmem %s548_s4, 256  ;;  %p550_p10 = scmp.lt.s32.totalorder %s170_s8, %s548_s4 }
  0x2a   : > { %p545_p4 = pnand %p543_p6, %p503_p2  ;;  %p551_p1 = scmp.lt.s32.totalorder %s549_s27, %s542_s16 }
  0x2c   : > { %p546_p7 = pneg %p545_p4  ;;  %p552_p13 = por %p551_p1, %p550_p10 }
  0x2e   : > { %p553_p3 = pnand %p552_p13, %p546_p7 }
  0x30   : > { %556 = shalt.err (!%p553_p3)
}
  0x31   : > { %433 = dma.hbm_to_vmem [thread:$0]  (!%p742_p0), %s168_s29, 128, %s170_s8, %s158_s15, %s644_s18, %s644_s18, %s645_s19  }
  0x32   : > { %181 = sbr.rel (%p763_p5) target bundleno = 138 (0x8a), region = 28  ;;  %s778_s25 = sand.u32 (!%p763_p5), 1, %s625_s10  }
  0x33   : > { %s408_s26 = sshll.u32 (!%p763_p5), %s778_s25, 3  ;;  %s184_s6 = scalar_lea.sflag (!%p763_p5), [#allocation3], %s778_s25 }
  0x34   : > { %s187_s20 = scalar_lea.vmem (!%p763_p5), [#allocation2], %s408_s26 }
  0x37   : > { %608 = dma.done.wait (%p711_p8), %s184_s6, 128  }
  0x38   : > { %610 = vsyncadd (%p711_p8), %s184_s6, 4294967168  ;;  %s193_s5 = scalar_lea.sflag [#allocation6], %s778_s25  ;;  %s787_s18 = scalar_lea.vmem [#allocation5], %s408_s26 }
  0x39   : > { %612 = dma.done.wait (%p711_p8), %s193_s5, 128  }
  0x3a   : > { %614 = vsyncadd (%p711_p8), %s193_s5, 4294967168  ;;  %v221_v0 = vld [vmem:[%s187_s20] sm:$0x3]  ;;  %v410_v1 = vld [vmem:[%s187_s20 + $0x2] sm:$0x3]  ;;  %v647_v26 = vmov 1.0  }
  0x3b   : > { %v227_v2 = vmax.f32 %v221_v0, %v410_v1  ;;  %v412_v3 = vld [vmem:[%s187_s20 + $0x4] sm:$0x3]  ;;  %v414_v4 = vld [vmem:[%s187_s20 + $0x6] sm:$0x3]  ;;  %v222_v15 = vld [vmem:[%s787_s18] sm:$0x3] }
  0x3c   : > { %v411_v16 = vld [vmem:[%s787_s18 + $0x2] sm:$0x3]  ;;  %v413_v24 = vld [vmem:[%s787_s18 + $0x4] sm:$0x3]  ;;  %v415_v29 = vld [vmem:[%s787_s18 + $0x6] sm:$0x3] }
  0x3d   : > { %v236_v5 = vmax.f32 %v227_v2, %v412_v3  ;;  %vm228_vm0 = vcmp.gt.f32.partialorder %v411_v16, %v222_v15  ;;  %vm272_vm3 = vcmask 1041408   ;;  %s220_s21 = scalar_lea.vmem [#allocation7], %s778_s25  ;;  %s416_s28 = sshll.u32 %s633_s12, 4 }
  0x3e   : > { %v229_v23 = vsel %vm228_vm0, %v411_v16, %v222_v15  ;;  %v231_v27 = vsel %vm228_vm0, 0.0, %v647_v26  ;;  %v230_v31 = vsel %vm228_vm0, %v410_v1, %v221_v0  ;;  %s295_s19 = sshll.u32 %s220_s21, 4  ;;  %s293_s7 = scalar_lea.hbm %s840_s2, %s416_s28  ;;  %s296_s19 = int_to_ptr.vmem [resolvable:$true] %s295_s19 }
  0x3f   : > { %v245_v6 = vmax.f32 %v236_v5, %v414_v4  ;;  %vm237_vm1 = vcmp.gt.f32.partialorder %v413_v24, %v229_v23  ;;  %s282_s8 = scalar_lea.sflag [#allocation4], %s778_s25  ;;  %s557_s15 = scalar_lea.vmem %s296_s19, 16 }
  0x40   : > { %v238_v28 = vsel %vm237_vm1, %v413_v24, %v229_v23  ;;  %v240_v30 = vsel %vm237_vm1, 0.0, %v231_v27  ;;  %v239_v33 = vsel %vm237_vm1, %v412_v3, %v230_v31  ;;  %p558_p8 = scmp.ne.s32.totalorder %s296_s19, %s557_s15  ;;  %s648_s16 = smov [#allocation7]  }
  0x41   : > { %v251_v7 = vsub.f32 %v221_v0, %v245_v6  ;;  %v255_v8 = vsub.f32 %v410_v1, %v245_v6  ;;  %v259_v9 = vsub.f32 %v412_v3, %v245_v6  ;;  %v263_v10 = vsub.f32 %v414_v4, %v245_v6  ;;  %s561_s30 = sshll.u32 %s648_s16, 4  ;;  %s562_s30 = int_to_ptr.vmem [resolvable:$false] %s561_s30 }
  0x42   : > { %vm246_vm2 = vcmp.gt.f32.partialorder %v415_v29, %v238_v28  ;;  %p559_p0 = pnand %p558_p8, %p715_p9  ;;  %s563_s4 = scalar_lea.vmem %s562_s30, 32 }
  0x43   : > { %v252_v11 = vmul.f32 1.442695, %v251_v7  ;;  %v256_v12 = vmul.f32 1.442695, %v255_v8  ;;  %v260_v13 = vmul.f32 1.442695, %v259_v9  ;;  %v247_v37 = vsel %vm246_vm2, %v414_v4, %v239_v33  ;;  %p564_p5 = scmp.lt.s32.totalorder %s296_s19, %s562_s30  ;;  %p565_p6 = scmp.lt.s32.totalorder %s563_s4, %s557_s15 }
  0x44   : > { %v264_v14 = vmul.f32 1.442695, %v263_v10  ;;  %v248_v32 = vsel %vm246_vm2, 0.0, %v240_v30  ;;  %p560_p2 = pneg %p559_p0 }
  0x45   : > { %491 = vpow2.f32 %v252_v11  ;;  %v249_v34 = vmul.f32 -0.7, %v248_v32  ;;  %p566_p4 = por %p565_p6, %p564_p5 }
  0x46   : > { %493 = vpow2.f32 %v256_v12 }
  0x47   : > { %495 = vpow2.f32 %v260_v13  ;;  %v250_v38 = vadd.f32 1.0, %v249_v34  ;;  %p567_p7 = pnand %p566_p4, %p560_p2 }
  0x48   : > { %497 = vpow2.f32 %v264_v14 }
  0x52   : > { %v492_v17 = vpop.eup %491 }
  0x53   : > { %v494_v18 = vpop.eup %493 }
  0x54   : > { %v496_v19 = vpop.eup %495  ;;  %v258_v20 = vadd.f32 %v494_v18, %v492_v17 }
  0x55   : > { %v498_v21 = vpop.eup %497 }
  0x56   : > { %v262_v22 = vadd.f32 %v496_v19, %v258_v20 }
  0x58   : > { %v266_v25 = vadd.f32 %v498_v21, %v262_v22 }
  0x5a   : > { %499 = vlog2.f32 %v266_v25 }
  0x67   : > { %v500_v35 = vpop.eup %499 }
  0x68   : > { %v268_v36 = vmul.f32 0.6931472, %v500_v35 }
  0x6a   : > { %v269_v39 = vadd.f32 %v268_v36, %v245_v6 }
  0x6c   : > { %v270_v40 = vsub.f32 %v269_v39, %v247_v37 }
  0x6e   : > { %v271_v41 = vmul.f32 %v270_v40, %v250_v38 }
  0x70   : > { %v273_v42 = vsel %vm272_vm3, %v271_v41, 0.0 }
  0x71   : > { %v274_v43 = vrot.slane %v273_v42, 4 }
  0x73   : > { %v275_v44 = vadd.f32 %v274_v43, %v273_v42 }
  0x75   : > { %v276_v45 = vrot.slane %v275_v44, 2 }
  0x77   : > { %v277_v46 = vadd.f32 %v276_v45, %v275_v44 }
  0x79   : > { %v278_v47 = vrot.slane %v277_v46, 1 }
  0x7b   : > { %v279_v48 = vadd.f32 %v278_v47, %v277_v46 }
  0x7d   : > { %280 = vst [vmem:[%s220_s21] sm:$0x1] %v279_v48 }
  0x7e   : > { %570 = shalt.err (!%p567_p7)
}
  0x7f   : > { %s571_s12 = scalar_lea.hbm %s293_s7, 16  ;;  %s575_s26 = scalar_lea.hbm %s840_s2, 32 }
  0x80   : > { %p572_p10 = scmp.ne.s32.totalorder %s293_s7, %s571_s12  ;;  %p576_p3 = scmp.lt.s32.totalorder %s293_s7, %s840_s2 }
  0x81   : > { %p577_p8 = scmp.lt.s32.totalorder %s575_s26, %s571_s12 }
  0x82   : > { %p573_p1 = pnand %p572_p10, %p715_p9 }
  0x83   : > { %p578_p0 = por %p577_p8, %p576_p3 }
  0x84   : > { %p574_p13 = pneg %p573_p1 }
  0x86   : > { %p579_p12 = pnand %p578_p0, %p574_p13 }
  0x88   : > { %582 = shalt.err (!%p579_p12)
}
  0x89   : > { %425 = dma.vmem_to_hbm [thread:$0]  (%p715_p9), %s296_s19, 16, %s293_s7, %s282_s8  }
  0x8a PF: > { %s307_s5 = sand.u32 1, %s621_s9   ;;  %p847_p2 = scmp.ge.s32.totalorder %s641_s14, 2 }
  0x8b   : > { %s308_s18 = scalar_lea.sflag [#allocation4], %s307_s5 }
  0x8c   : > { %p435_p5 = pnand %p847_p2, %p722_p11 }
  0x8e   : > { %p436_p6 = pneg %p435_p5 }
  0x90   : > { %616 = dma.done.wait (%p436_p6), %s308_s18, 16  }
  0x91   : > { %618 = vsyncadd (%p436_p6), %s308_s18, 4294967280  ;;  %s21_s14 = sadd.s32 1, %s641_s14   ;;  %s848_s9 = smov %s625_s10 }
  0x92   : > { %p18_p4 = scmp.ge.s32.totalorder %s21_s14, 4   ;;  %s849_s10 = smov %s629_s11 }
  0x93   : > { %s850_s11 = smov %s720_s23  ;;  %s851_s12 = smov %s637_s13 }
  0x94   : > { %s852_s13 = smov %s854_s17  ;;  %20 = sbr.rel (!%p18_p4) target bundleno = 8 (0x8), region = 92 }
  0x99   :  { %312 = vsyncpa [#allocation3], 1 }
  0x9a   :  { %314 = vsyncpa [#allocation3 + $0x1], 1 }
  0x9b   :  { %315 = vsyncpa [#allocation6], 1 }
  0x9c   :  { %317 = vsyncpa [#allocation6 + $0x1], 1 }
  0x9d   :  { %318 = vsyncpa [#allocation4], 1 }
  0x9e   :  { %320 = vsyncpa [#allocation4 + $0x1], 1 }

</bundles_post_ra>
